<compile_context>
chip_gen: v7x
topology: tpu7x:2x2x1
jax: 0.10.0
libtpu: 0.0.40
codegen_flags: <defaults>
</compile_context>

<pallas_src>
import functools

import jax
import jax.numpy as jnp
from jax.experimental import pallas as pl
from jax.experimental.pallas import tpu as pltpu


def _softplus(x):
    # numerically stable softplus: max(x, 0) + log1p(exp(-|x|))
    return jnp.maximum(x, 0.0) + jnp.log1p(jnp.exp(-jnp.abs(x)))


def _sigmoid(x):
    return 1.0 / (1.0 + jnp.exp(-x))


def _round_up(x, m):
    return ((x + m - 1) // m) * m


def _fused_kernel(dp,
                  pre_in_ref,          # (TM, dp) bf16 : x@w_in + b_in + emb
                  tot_ref,             # (TM, dp) bf16 : spatial+temporal embeddings
                  eps_ref,             # (TM, dp) f32  : uniform [0,1) (torch.rand_like)
                  w_e1_ref, b_e1_ref,  # (dp, dp) bf16, (1, dp) f32
                  w_u1_ref, b_u1_ref,  # (dp, dp) bf16, (1, dp) f32
                  w_u2_ref, b_u2_ref,  # (dp, 2dp) bf16, (1, 2dp) f32   [miu | sigma]
                  w_e2_ref, b_e2_ref,  # (dp, dp) bf16, (1, dp) f32
                  wph_ref, bph_ref,    # (dp, 2dp) bf16, (1, 2dp) f32   [gate_p | out]
                  wuh_ref, buh_ref,    # (dp, 2dp) bf16, (1, 2dp) f32   [gate_u | sig]
                  out_ref, sig_ref):   # (TM, dp) f32 each
    f32 = jnp.float32
    bf16 = jnp.bfloat16

    # --- encoder "pre" branch (stand-in): relu((x@w_in + b_in + emb) @ w_e1 + b_e1).
    # The x-dependent part was folded into pre_in by the wrapper (tiny XLA matmul).
    pre = jnp.maximum(
        jnp.dot(pre_in_ref[...], w_e1_ref[...], preferred_element_type=f32)
        + b_e1_ref[...], 0.0)

    # --- generate_init_uncertainty (stib=True, sampling=True) ---
    h1 = jnp.maximum(
        jnp.dot(tot_ref[...], w_u1_ref[...], preferred_element_type=f32)
        + b_u1_ref[...], 0.0)
    ms = jnp.dot(h1.astype(bf16), w_u2_ref[...], preferred_element_type=f32) + b_u2_ref[...]
    miu = ms[:, :dp]                     # lane-aligned split (dp % 128 == 0)
    sig = ms[:, dp:]
    uncertainty = miu + eps_ref[...] * sig

    # --- encoder uncertainty branch (stand-in) ---
    # TODO(synk): the real `encoder` module is injected at construction time and is not
    # defined in the reference file; this is a structural stand-in.
    unc = jnp.maximum(
        jnp.dot(uncertainty.astype(bf16), w_e2_ref[...], preferred_element_type=f32)
        + b_e2_ref[...], 0.0)

    # --- final_gate (stand-in) + positivity_constraint ---
    # TODO(synk): the real `final_gate` module is injected; stand-in preserves the
    # (output, sigma) contract.
    ph = jnp.dot(pre.astype(bf16), wph_ref[...], preferred_element_type=f32) + bph_ref[...]
    uh = jnp.dot(unc.astype(bf16), wuh_ref[...], preferred_element_type=f32) + buh_ref[...]

    gate = _sigmoid(ph[:, :dp] + uh[:, :dp])        # pre@wg_p + b_g + unc@wg_u
    out_ref[...] = gate * ph[:, dp:]                # gate * (pre@w_o + b_o)
    sig_ref[...] = _softplus(uh[:, dp:]) + 1e-6     # positivity_constraint(unc@w_s + b_s)


def encoder_decoder_forward(params, source_flow, timestamps, rng_key):
    """source_flow: (B, N, T, F_in) f32, timestamps: (B, T) int32, rng_key: PRNG key."""
    B, N, T, F_in = source_flow.shape
    d = params["w_in"].shape[1]
    dp = _round_up(d, 128)               # lane-align d_model (lane-dense splits/stores)
    M = B * N * T
    f32, bf16 = jnp.float32, jnp.bfloat16

    def pad_c(a):                         # zero-pad last dim to dp
        return jnp.pad(a, ((0, 0), (0, dp - a.shape[-1])))

    def pad_rc(a):                        # zero-pad both dims to dp
        return jnp.pad(a, ((0, dp - a.shape[0]), (0, dp - a.shape[-1])))

    # --- glue: spatial/temporal embedding lookup + broadcast-sum (XLA) ---
    spatial = pad_c(params["spatial_emb"])                       # (N, dp)
    temporal = pad_c(params["temporal_emb"])[timestamps]         # (B, T, dp)
    total = (spatial[None, :, None, :] + temporal[:, None, :, :]).reshape(M, dp)

    # --- fold input_mapping into the streamed pre-branch operand (tiny XLA matmul) ---
    w_in = pad_c(params["w_in"])                                 # (F_in, dp)
    b_in = pad_c(params["b_in"])                                 # (1, dp)
    pre_in = source_flow.reshape(M, F_in).astype(f32) @ w_in + b_in + total

    # --- bf16 weights (zero-padded), column-concatenated pairs (shared-LHS fusion) ---
    w_e1 = pad_rc(params["w_e1"]).astype(bf16); b_e1 = pad_c(params["b_e1"])
    w_u1 = pad_rc(params["w_u1"]).astype(bf16); b_u1 = pad_c(params["b_u1"])
    w_u2 = jnp.concatenate([pad_rc(params["w_u2_mu"]),
                            pad_rc(params["w_u2_sg"])], axis=1).astype(bf16)
    b_u2 = jnp.concatenate([pad_c(params["b_u2_mu"]), pad_c(params["b_u2_sg"])], axis=1)
    w_e2 = pad_rc(params["w_e2"]).astype(bf16); b_e2 = pad_c(params["b_e2"])
    wph = jnp.concatenate([pad_rc(params["wg_p"]), pad_rc(params["w_o"])], axis=1).astype(bf16)
    bph = jnp.concatenate([pad_c(params["b_g"]), pad_c(params["b_o"])], axis=1)
    wuh = jnp.concatenate([pad_rc(params["wg_u"]), pad_rc(params["w_s"])], axis=1).astype(bf16)
    buh = jnp.concatenate([jnp.zeros((1, dp), f32), pad_c(params["b_s"])], axis=1)

    weights = (w_e1, b_e1, w_u1, b_u1, w_u2, b_u2, w_e2, b_e2, wph, bph, wuh, buh)
    weight_bytes = sum(int(w.size) * w.dtype.itemsize for w in weights)

    # --- row tile from a VMEM budget (conservative for v7x's 64 MiB physical VMEM) ---
    # Per-step streamed bytes/row: 2 bf16 inputs + 1 f32 input + 2 f32 outputs.
    stream_bytes_per_row = dp * (2 + 2 + 4 + 4 + 4)
    VMEM_BUDGET = 28 << 20
    tm_cap = (VMEM_BUDGET - 2 * weight_bytes) // (2 * stream_bytes_per_row)
    tm_cap = max(8, (int(tm_cap) // 8) * 8)
    TM = min(1024, tm_cap)               # 1024 ~ 86% of HBM roofline; bigger is wasted
    if M <= TM:
        # TODO(synk): on v7x (2 TensorCores) a chip-gated 2-way split of tiny problems
        # would balance cores; kept single-tile here to avoid per-step overhead on
        # single-core chips.
        TM = _round_up(M, 8)
    M_pad = _round_up(M, TM)
    grid = (M_pad // TM,)

    if M_pad != M:
        pre_in = jnp.pad(pre_in, ((0, M_pad - M), (0, 0)))
        total = jnp.pad(total, ((0, M_pad - M), (0, 0)))

    # epsilon = torch.rand_like(sigma): uniform [0,1), generated by XLA and streamed
    # (in-kernel pltpu PRNG is not lowerable on the CPU/interpret path).
    eps = jax.random.uniform(rng_key, (M_pad, dp), f32)

    pre_in_b = pre_in.astype(bf16)
    total_b = total.astype(bf16)

    row_spec = pl.BlockSpec((TM, dp), lambda i: (i, 0))

    def w_spec(a):                        # resident (constant block index) operand
        return pl.BlockSpec(a.shape, lambda i: (0, 0))

    vmem_need = 2 * TM * stream_bytes_per_row + 2 * weight_bytes + (4 << 20)
    vmem_limit = int(min(max(vmem_need, 32 << 20), 48 << 20))

    out_pad, sig_pad = pl.pallas_call(
        functools.partial(_fused_kernel, dp),
        grid=grid,
        in_specs=[row_spec, row_spec, row_spec] + [w_spec(w) for w in weights],
        out_specs=(pl.BlockSpec((TM, dp), lambda i: (i, 0)),
                   pl.BlockSpec((TM, dp), lambda i: (i, 0))),
        out_shape=(jax.ShapeDtypeStruct((M_pad, dp), f32),
                   jax.ShapeDtypeStruct((M_pad, dp), f32)),
        compiler_params=pltpu.CompilerParams(
            dimension_semantics=("parallel",),
            vmem_limit_bytes=vmem_limit),
    )(pre_in_b, total_b, eps, *weights)

    output = out_pad[:M, :d].reshape(B, N, T, d)
    sigma = sig_pad[:M, :d].reshape(B, N, T, d)
    return output, sigma


def init_params(key, F_in, d, num_of_vertices, num_of_timeslices):
    ks = jax.random.split(key, 24)
    lin = lambda k, m, n: 0.1 * jax.random.normal(k, (m, n), jnp.float32)
    bias = lambda k, n: 0.01 * jax.random.normal(k, (1, n), jnp.float32)
    return {
        "spatial_emb":  0.1 * jax.random.normal(ks[0], (num_of_vertices, d), jnp.float32),
        "temporal_emb": 0.1 * jax.random.normal(ks[1], (num_of_timeslices, d), jnp.float32),
        "w_in":  lin(ks[2], F_in, d), "b_in":  bias(ks[3], d),
        "w_u1":  lin(ks[4], d, d),    "b_u1":  bias(ks[5], d),
        "w_u2_mu": lin(ks[6], d, d),  "w_u2_sg": lin(ks[7], d, d),
        "b_u2_mu": bias(ks[8], d),    "b_u2_sg": bias(ks[9], d),
        "w_e1":  lin(ks[10], d, d),   "b_e1":  bias(ks[11], d),
        "w_e2":  lin(ks[12], d, d),   "b_e2":  bias(ks[13], d),
        "wg_p":  lin(ks[14], d, d),   "wg_u":  lin(ks[15], d, d),
        "b_g":   bias(ks[16], d),
        "w_o":   lin(ks[17], d, d),   "b_o":   bias(ks[18], d),
        "w_s":   lin(ks[19], d, d),   "b_s":   bias(ks[20], d),
    }


if __name__ == "__main__":
    B, N, T, F_in = 2, 4, 8, 2          # batch, vertices, history steps, input features
    d_model = 32
    num_of_vertices = N
    num_of_timeslices = 288

    key = jax.random.PRNGKey(0)
    k_param, k_x, k_t, k_eps = jax.random.split(key, 4)

    params = init_params(k_param, F_in, d_model, num_of_vertices, num_of_timeslices)
    source_flow = jax.random.normal(k_x, (B, N, T, F_in), jnp.float32)
    timestamps = jax.random.randint(k_t, (B, T), 0, num_of_timeslices, jnp.int32)

    output, sigma = jax.jit(encoder_decoder_forward)(params, source_flow, timestamps, k_eps)
    jax.block_until_ready((output, sigma))

    assert output.shape == (B, N, T, d_model)
    assert sigma.shape == (B, N, T, d_model)
    assert bool(jnp.all(sigma > 0.0))   # positivity_constraint guarantee
    assert bool(jnp.all(jnp.isfinite(output))) and bool(jnp.all(jnp.isfinite(sigma)))
    print("KERNEL_OK")
</pallas_src>

<mosaic_0001>
module attributes {stable_mosaic.version = 11 : i64} {
  func.func @_fused_kernel(%arg0: i32, %arg1: memref<64x128xbf16, #tpu.memory_space<vmem>>, %arg2: memref<64x128xbf16, #tpu.memory_space<vmem>>, %arg3: memref<64x128xf32, #tpu.memory_space<vmem>>, %arg4: memref<128x128xbf16, #tpu.memory_space<vmem>>, %arg5: memref<1x128xf32, #tpu.memory_space<vmem>>, %arg6: memref<128x128xbf16, #tpu.memory_space<vmem>>, %arg7: memref<1x128xf32, #tpu.memory_space<vmem>>, %arg8: memref<128x256xbf16, #tpu.memory_space<vmem>>, %arg9: memref<1x256xf32, #tpu.memory_space<vmem>>, %arg10: memref<128x128xbf16, #tpu.memory_space<vmem>>, %arg11: memref<1x128xf32, #tpu.memory_space<vmem>>, %arg12: memref<128x256xbf16, #tpu.memory_space<vmem>>, %arg13: memref<1x256xf32, #tpu.memory_space<vmem>>, %arg14: memref<128x256xbf16, #tpu.memory_space<vmem>>, %arg15: memref<1x256xf32, #tpu.memory_space<vmem>>, %arg16: memref<64x128xf32, #tpu.memory_space<vmem>>, %arg17: memref<64x128xf32, #tpu.memory_space<vmem>>) attributes {dimension_semantics = [#tpu.dimension_semantics<parallel>], iteration_bounds = array<i64: 1>, scalar_prefetch = 0 : i64, scratch_operands = 0 : i64, tpu.core_type = #tpu.core_type<tc>, window_params = [{transform_indices = @transform_0, window_bounds = array<i64: 64, 128>}, {transform_indices = @transform_1, window_bounds = array<i64: 64, 128>}, {transform_indices = @transform_2, window_bounds = array<i64: 64, 128>}, {pipeline_mode = #tpu.pipeline_mode<synchronous>, transform_indices = @transform_3, window_bounds = array<i64: 128, 128>}, {pipeline_mode = #tpu.pipeline_mode<synchronous>, transform_indices = @transform_4, window_bounds = array<i64: 1, 128>}, {pipeline_mode = #tpu.pipeline_mode<synchronous>, transform_indices = @transform_5, window_bounds = array<i64: 128, 128>}, {pipeline_mode = #tpu.pipeline_mode<synchronous>, transform_indices = @transform_6, window_bounds = array<i64: 1, 128>}, {pipeline_mode = #tpu.pipeline_mode<synchronous>, transform_indices = @transform_7, window_bounds = array<i64: 128, 256>}, {pipeline_mode = #tpu.pipeline_mode<synchronous>, transform_indices = @transform_8, window_bounds = array<i64: 1, 256>}, {pipeline_mode = #tpu.pipeline_mode<synchronous>, transform_indices = @transform_9, window_bounds = array<i64: 128, 128>}, {pipeline_mode = #tpu.pipeline_mode<synchronous>, transform_indices = @transform_10, window_bounds = array<i64: 1, 128>}, {pipeline_mode = #tpu.pipeline_mode<synchronous>, transform_indices = @transform_11, window_bounds = array<i64: 128, 256>}, {pipeline_mode = #tpu.pipeline_mode<synchronous>, transform_indices = @transform_12, window_bounds = array<i64: 1, 256>}, {pipeline_mode = #tpu.pipeline_mode<synchronous>, transform_indices = @transform_13, window_bounds = array<i64: 128, 256>}, {pipeline_mode = #tpu.pipeline_mode<synchronous>, transform_indices = @transform_14, window_bounds = array<i64: 1, 256>}, {transform_indices = @transform_15, window_bounds = array<i64: 64, 128>}, {transform_indices = @transform_16, window_bounds = array<i64: 64, 128>}]} {
    %c0 = arith.constant 0 : index
    %c0_0 = arith.constant 0 : index
    %0 = vector.load %arg1[%c0, %c0_0] : memref<64x128xbf16, #tpu.memory_space<vmem>>, vector<64x128xbf16>
    %c0_1 = arith.constant 0 : index
    %c0_2 = arith.constant 0 : index
    %1 = vector.load %arg4[%c0_1, %c0_2] : memref<128x128xbf16, #tpu.memory_space<vmem>>, vector<128x128xbf16>
    %cst = arith.constant dense<0.000000e+00> : vector<64x128xf32>
    %2 = tpu.matmul %0, %1, %cst {dimension_numbers = #tpu.dot_dimension_numbers<[1], [0], [0], [1], [0, 0, 1, 1], [], []>} : vector<64x128xbf16>, vector<128x128xbf16>, vector<64x128xf32> -> vector<64x128xf32>
    %c0_3 = arith.constant 0 : index
    %c0_4 = arith.constant 0 : index
    %3 = vector.load %arg5[%c0_3, %c0_4] : memref<1x128xf32, #tpu.memory_space<vmem>>, vector<1x128xf32>
    %4 = vector.broadcast %3 : vector<1x128xf32> to vector<64x128xf32>
    %5 = arith.addf %2, %4 : vector<64x128xf32>
    %cst_5 = arith.constant 0.000000e+00 : f32
    %6 = vector.broadcast %cst_5 : f32 to vector<64x128xf32>
    %7 = arith.maximumf %5, %6 : vector<64x128xf32>
    %c0_6 = arith.constant 0 : index
    %c0_7 = arith.constant 0 : index
    %8 = vector.load %arg2[%c0_6, %c0_7] : memref<64x128xbf16, #tpu.memory_space<vmem>>, vector<64x128xbf16>
    %c0_8 = arith.constant 0 : index
    %c0_9 = arith.constant 0 : index
    %9 = vector.load %arg6[%c0_8, %c0_9] : memref<128x128xbf16, #tpu.memory_space<vmem>>, vector<128x128xbf16>
    %cst_10 = arith.constant dense<0.000000e+00> : vector<64x128xf32>
    %10 = tpu.matmul %8, %9, %cst_10 {dimension_numbers = #tpu.dot_dimension_numbers<[1], [0], [0], [1], [0, 0, 1, 1], [], []>} : vector<64x128xbf16>, vector<128x128xbf16>, vector<64x128xf32> -> vector<64x128xf32>
    %c0_11 = arith.constant 0 : index
    %c0_12 = arith.constant 0 : index
    %11 = vector.load %arg7[%c0_11, %c0_12] : memref<1x128xf32, #tpu.memory_space<vmem>>, vector<1x128xf32>
    %12 = vector.broadcast %11 : vector<1x128xf32> to vector<64x128xf32>
    %13 = arith.addf %10, %12 : vector<64x128xf32>
    %cst_13 = arith.constant 0.000000e+00 : f32
    %14 = vector.broadcast %cst_13 : f32 to vector<64x128xf32>
    %15 = arith.maximumf %13, %14 : vector<64x128xf32>
    %16 = arith.truncf %15 : vector<64x128xf32> to vector<64x128xbf16>
    %c0_14 = arith.constant 0 : index
    %c0_15 = arith.constant 0 : index
    %17 = vector.load %arg8[%c0_14, %c0_15] : memref<128x256xbf16, #tpu.memory_space<vmem>>, vector<128x256xbf16>
    %cst_16 = arith.constant dense<0.000000e+00> : vector<64x256xf32>
    %18 = tpu.matmul %16, %17, %cst_16 {dimension_numbers = #tpu.dot_dimension_numbers<[1], [0], [0], [1], [0, 0, 1, 1], [], []>} : vector<64x128xbf16>, vector<128x256xbf16>, vector<64x256xf32> -> vector<64x256xf32>
    %c0_17 = arith.constant 0 : index
    %c0_18 = arith.constant 0 : index
    %19 = vector.load %arg9[%c0_17, %c0_18] : memref<1x256xf32, #tpu.memory_space<vmem>>, vector<1x256xf32>
    %20 = vector.broadcast %19 : vector<1x256xf32> to vector<64x256xf32>
    %21 = arith.addf %18, %20 : vector<64x256xf32>
    %22 = vector.extract_strided_slice %21 {offsets = [0, 0], sizes = [64, 128], strides = [1, 1]} : vector<64x256xf32> to vector<64x128xf32>
    %23 = vector.extract_strided_slice %21 {offsets = [0, 128], sizes = [64, 128], strides = [1, 1]} : vector<64x256xf32> to vector<64x128xf32>
    %c0_19 = arith.constant 0 : index
    %c0_20 = arith.constant 0 : index
    %24 = vector.load %arg3[%c0_19, %c0_20] : memref<64x128xf32, #tpu.memory_space<vmem>>, vector<64x128xf32>
    %25 = arith.mulf %24, %23 : vector<64x128xf32>
    %26 = arith.addf %22, %25 : vector<64x128xf32>
    %27 = arith.truncf %26 : vector<64x128xf32> to vector<64x128xbf16>
    %c0_21 = arith.constant 0 : index
    %c0_22 = arith.constant 0 : index
    %28 = vector.load %arg10[%c0_21, %c0_22] : memref<128x128xbf16, #tpu.memory_space<vmem>>, vector<128x128xbf16>
    %cst_23 = arith.constant dense<0.000000e+00> : vector<64x128xf32>
    %29 = tpu.matmul %27, %28, %cst_23 {dimension_numbers = #tpu.dot_dimension_numbers<[1], [0], [0], [1], [0, 0, 1, 1], [], []>} : vector<64x128xbf16>, vector<128x128xbf16>, vector<64x128xf32> -> vector<64x128xf32>
    %c0_24 = arith.constant 0 : index
    %c0_25 = arith.constant 0 : index
    %30 = vector.load %arg11[%c0_24, %c0_25] : memref<1x128xf32, #tpu.memory_space<vmem>>, vector<1x128xf32>
    %31 = vector.broadcast %30 : vector<1x128xf32> to vector<64x128xf32>
    %32 = arith.addf %29, %31 : vector<64x128xf32>
    %cst_26 = arith.constant 0.000000e+00 : f32
    %33 = vector.broadcast %cst_26 : f32 to vector<64x128xf32>
    %34 = arith.maximumf %32, %33 : vector<64x128xf32>
    %35 = arith.truncf %7 : vector<64x128xf32> to vector<64x128xbf16>
    %c0_27 = arith.constant 0 : index
    %c0_28 = arith.constant 0 : index
    %36 = vector.load %arg12[%c0_27, %c0_28] : memref<128x256xbf16, #tpu.memory_space<vmem>>, vector<128x256xbf16>
    %cst_29 = arith.constant dense<0.000000e+00> : vector<64x256xf32>
    %37 = tpu.matmul %35, %36, %cst_29 {dimension_numbers = #tpu.dot_dimension_numbers<[1], [0], [0], [1], [0, 0, 1, 1], [], []>} : vector<64x128xbf16>, vector<128x256xbf16>, vector<64x256xf32> -> vector<64x256xf32>
    %c0_30 = arith.constant 0 : index
    %c0_31 = arith.constant 0 : index
    %38 = vector.load %arg13[%c0_30, %c0_31] : memref<1x256xf32, #tpu.memory_space<vmem>>, vector<1x256xf32>
    %39 = vector.broadcast %38 : vector<1x256xf32> to vector<64x256xf32>
    %40 = arith.addf %37, %39 : vector<64x256xf32>
    %41 = arith.truncf %34 : vector<64x128xf32> to vector<64x128xbf16>
    %c0_32 = arith.constant 0 : index
    %c0_33 = arith.constant 0 : index
    %42 = vector.load %arg14[%c0_32, %c0_33] : memref<128x256xbf16, #tpu.memory_space<vmem>>, vector<128x256xbf16>
    %cst_34 = arith.constant dense<0.000000e+00> : vector<64x256xf32>
    %43 = tpu.matmul %41, %42, %cst_34 {dimension_numbers = #tpu.dot_dimension_numbers<[1], [0], [0], [1], [0, 0, 1, 1], [], []>} : vector<64x128xbf16>, vector<128x256xbf16>, vector<64x256xf32> -> vector<64x256xf32>
    %c0_35 = arith.constant 0 : index
    %c0_36 = arith.constant 0 : index
    %44 = vector.load %arg15[%c0_35, %c0_36] : memref<1x256xf32, #tpu.memory_space<vmem>>, vector<1x256xf32>
    %45 = vector.broadcast %44 : vector<1x256xf32> to vector<64x256xf32>
    %46 = arith.addf %43, %45 : vector<64x256xf32>
    %47 = vector.extract_strided_slice %40 {offsets = [0, 0], sizes = [64, 128], strides = [1, 1]} : vector<64x256xf32> to vector<64x128xf32>
    %48 = vector.extract_strided_slice %46 {offsets = [0, 0], sizes = [64, 128], strides = [1, 1]} : vector<64x256xf32> to vector<64x128xf32>
    %49 = arith.addf %47, %48 : vector<64x128xf32>
    %cst_37 = arith.constant 0.000000e+00 : f32
    %50 = vector.broadcast %cst_37 : f32 to vector<64x128xf32>
    %51 = arith.subf %50, %49 : vector<64x128xf32>
    %52 = math.exp %51 : vector<64x128xf32>
    %cst_38 = arith.constant 1.000000e+00 : f32
    %53 = vector.broadcast %cst_38 : f32 to vector<64x128xf32>
    %54 = arith.addf %53, %52 : vector<64x128xf32>
    %cst_39 = arith.constant 1.000000e+00 : f32
    %55 = vector.broadcast %cst_39 : f32 to vector<64x128xf32>
    %56 = arith.divf %55, %54 : vector<64x128xf32>
    %57 = vector.extract_strided_slice %40 {offsets = [0, 128], sizes = [64, 128], strides = [1, 1]} : vector<64x256xf32> to vector<64x128xf32>
    %58 = arith.mulf %56, %57 : vector<64x128xf32>
    %c0_40 = arith.constant 0 : index
    %c0_41 = arith.constant 0 : index
    %59 = vector.load %arg16[%c0_40, %c0_41] : memref<64x128xf32, #tpu.memory_space<vmem>>, vector<64x128xf32>
    tpu.vector_store %arg16[%c0_40, %c0_41], %58 {strides = array<i32>} : memref<64x128xf32, #tpu.memory_space<vmem>>, vector<64x128xf32>,
    %60 = vector.extract_strided_slice %46 {offsets = [0, 128], sizes = [64, 128], strides = [1, 1]} : vector<64x256xf32> to vector<64x128xf32>
    %cst_42 = arith.constant 0.000000e+00 : f32
    %61 = vector.broadcast %cst_42 : f32 to vector<64x128xf32>
    %62 = arith.maximumf %60, %61 : vector<64x128xf32>
    %63 = math.absf %60 : vector<64x128xf32>
    %cst_43 = arith.constant 0.000000e+00 : f32
    %64 = vector.broadcast %cst_43 : f32 to vector<64x128xf32>
    %65 = arith.subf %64, %63 : vector<64x128xf32>
    %66 = math.exp %65 : vector<64x128xf32>
    %67 = math.log1p %66 : vector<64x128xf32>
    %68 = arith.addf %62, %67 : vector<64x128xf32>
    %cst_44 = arith.constant 9.99999997E-7 : f32
    %69 = vector.broadcast %cst_44 : f32 to vector<64x128xf32>
    %70 = arith.addf %68, %69 : vector<64x128xf32>
    %c0_45 = arith.constant 0 : index
    %c0_46 = arith.constant 0 : index
    %71 = vector.load %arg17[%c0_45, %c0_46] : memref<64x128xf32, #tpu.memory_space<vmem>>, vector<64x128xf32>
    tpu.vector_store %arg17[%c0_45, %c0_46], %70 {strides = array<i32>} : memref<64x128xf32, #tpu.memory_space<vmem>>, vector<64x128xf32>,
    return
  }
  func.func @transform_0(%arg0: i32) -> (i32, i32) {
    %c0_i32 = arith.constant 0 : i32
    %c0_i32_0 = arith.constant 0 : i32
    return %arg0, %c0_i32 : i32, i32
  }
  func.func @transform_1(%arg0: i32) -> (i32, i32) {
    %c0_i32 = arith.constant 0 : i32
    %c0_i32_0 = arith.constant 0 : i32
    return %arg0, %c0_i32 : i32, i32
  }
  func.func @transform_2(%arg0: i32) -> (i32, i32) {
    %c0_i32 = arith.constant 0 : i32
    %c0_i32_0 = arith.constant 0 : i32
    return %arg0, %c0_i32 : i32, i32
  }
  func.func @transform_3(%arg0: i32) -> (i32, i32) {
    %c0_i32 = arith.constant 0 : i32
    %c0_i32_0 = arith.constant 0 : i32
    %c0_i32_1 = arith.constant 0 : i32
    return %c0_i32, %c0_i32_0 : i32, i32
  }
  func.func @transform_4(%arg0: i32) -> (i32, i32) {
    %c0_i32 = arith.constant 0 : i32
    %c0_i32_0 = arith.constant 0 : i32
    %c0_i32_1 = arith.constant 0 : i32
    return %c0_i32, %c0_i32_0 : i32, i32
  }
  func.func @transform_5(%arg0: i32) -> (i32, i32) {
    %c0_i32 = arith.constant 0 : i32
    %c0_i32_0 = arith.constant 0 : i32
    %c0_i32_1 = arith.constant 0 : i32
    return %c0_i32, %c0_i32_0 : i32, i32
  }
  func.func @transform_6(%arg0: i32) -> (i32, i32) {
    %c0_i32 = arith.constant 0 : i32
    %c0_i32_0 = arith.constant 0 : i32
    %c0_i32_1 = arith.constant 0 : i32
    return %c0_i32, %c0_i32_0 : i32, i32
  }
  func.func @transform_7(%arg0: i32) -> (i32, i32) {
    %c0_i32 = arith.constant 0 : i32
    %c0_i32_0 = arith.constant 0 : i32
    %c0_i32_1 = arith.constant 0 : i32
    return %c0_i32, %c0_i32_0 : i32, i32
  }
  func.func @transform_8(%arg0: i32) -> (i32, i32) {
    %c0_i32 = arith.constant 0 : i32
    %c0_i32_0 = arith.constant 0 : i32
    %c0_i32_1 = arith.constant 0 : i32
    return %c0_i32, %c0_i32_0 : i32, i32
  }
  func.func @transform_9(%arg0: i32) -> (i32, i32) {
    %c0_i32 = arith.constant 0 : i32
    %c0_i32_0 = arith.constant 0 : i32
    %c0_i32_1 = arith.constant 0 : i32
    return %c0_i32, %c0_i32_0 : i32, i32
  }
  func.func @transform_10(%arg0: i32) -> (i32, i32) {
    %c0_i32 = arith.constant 0 : i32
    %c0_i32_0 = arith.constant 0 : i32
    %c0_i32_1 = arith.constant 0 : i32
    return %c0_i32, %c0_i32_0 : i32, i32
  }
  func.func @transform_11(%arg0: i32) -> (i32, i32) {
    %c0_i32 = arith.constant 0 : i32
    %c0_i32_0 = arith.constant 0 : i32
    %c0_i32_1 = arith.constant 0 : i32
    return %c0_i32, %c0_i32_0 : i32, i32
  }
  func.func @transform_12(%arg0: i32) -> (i32, i32) {
    %c0_i32 = arith.constant 0 : i32
    %c0_i32_0 = arith.constant 0 : i32
    %c0_i32_1 = arith.constant 0 : i32
    return %c0_i32, %c0_i32_0 : i32, i32
  }
  func.func @transform_13(%arg0: i32) -> (i32, i32) {
    %c0_i32 = arith.constant 0 : i32
    %c0_i32_0 = arith.constant 0 : i32
    %c0_i32_1 = arith.constant 0 : i32
    return %c0_i32, %c0_i32_0 : i32, i32
  }
  func.func @transform_14(%arg0: i32) -> (i32, i32) {
    %c0_i32 = arith.constant 0 : i32
    %c0_i32_0 = arith.constant 0 : i32
    %c0_i32_1 = arith.constant 0 : i32
    return %c0_i32, %c0_i32_0 : i32, i32
  }
  func.func @transform_15(%arg0: i32) -> (i32, i32) {
    %c0_i32 = arith.constant 0 : i32
    %c0_i32_0 = arith.constant 0 : i32
    return %arg0, %c0_i32 : i32, i32
  }
  func.func @transform_16(%arg0: i32) -> (i32, i32) {
    %c0_i32 = arith.constant 0 : i32
    %c0_i32_0 = arith.constant 0 : i32
    return %arg0, %c0_i32 : i32, i32
  }
}

</mosaic_0001>

<bundles_post_ra>
// kernel: encoder_decoder_forward.1
= control target key start
LH: loop header
LB: loop body
LE: loop exit
PB: predicated region body
PF: predicated region fallthrough
CT: control target
= control target key end

     0   :  { %s2400_s0 = inlined_call_operand.vmem [shape: bf16[64,128], index: 0, kind: input, shape index: {}]   ;;  %s2401_s1 = inlined_call_operand.vmem [shape: bf16[64,128], index: 1, kind: input, shape index: {}]   ;;  %s2402_s2 = inlined_call_operand.vmem [shape: f32[64,128], index: 2, kind: input, shape index: {}]   ;;  %s2403_s3 = inlined_call_operand.vmem [shape: bf16[128,128], index: 3, kind: input, shape index: {}]   ;;  %s2404_s4 = inlined_call_operand.vmem [shape: f32[1,128], index: 4, kind: input, shape index: {}]   ;;  %s2405_s5 = inlined_call_operand.vmem [shape: bf16[128,128], index: 5, kind: input, shape index: {}]   ;;  %s2406_s6 = inlined_call_operand.vmem [shape: f32[1,128], index: 6, kind: input, shape index: {}]   ;;  %s2407_s7 = inlined_call_operand.vmem [shape: bf16[128,256], index: 7, kind: input, shape index: {}]   ;;  %s2408_s8 = inlined_call_operand.vmem [shape: f32[1,256], index: 8, kind: input, shape index: {}]   ;;  %s2409_s9 = inlined_call_operand.vmem [shape: bf16[128,128], index: 9, kind: input, shape index: {}]   ;;  %s2410_s10 = inlined_call_operand.vmem [shape: f32[1,128], index: 10, kind: input, shape index: {}]   ;;  %s2411_s11 = inlined_call_operand.vmem [shape: bf16[128,256], index: 11, kind: input, shape index: {}]   ;;  %s2412_s12 = inlined_call_operand.vmem [shape: f32[1,256], index: 12, kind: input, shape index: {}]   ;;  %s2413_s13 = inlined_call_operand.vmem [shape: bf16[128,256], index: 13, kind: input, shape index: {}]   ;;  %s2414_s14 = inlined_call_operand.vmem [shape: f32[1,256], index: 14, kind: input, shape index: {}]   ;;  %s2415_s15 = inlined_call_operand.hbm [shape: f32[64,128], index: 15, kind: output, shape index: {0}]   ;;  %s2416_s16 = inlined_call_operand.hbm [shape: f32[64,128], index: 16, kind: output, shape index: {1}]  }
   0x1   :  { %2418 = sst [smem:[#allocation8_spill]] %s2400_s0 }
   0x2   :  { %22 = vsyncpa [#allocation3], 0  ;;  %v1570_v0 = vld [vmem:[%s2405_s5] sm:$0xff]   ;;  %v1571_v1 = vld [vmem:[%s2405_s5 + $0x8] sm:$0xff]   ;;  %s2419_s17 = sld [smem:[#allocation8_spill]] }
   0x3   :  { %1517 = vmatprep.subr.bf16.mxu1 %v1570_v0  ;;  %v1572_v2 = vld [vmem:[%s2405_s5 + $0x10] sm:$0xff]   ;;  %v1573_v3 = vld [vmem:[%s2405_s5 + $0x18] sm:$0xff]   ;;  %v1578_v4 = vld [vmem:[%s2401_s1] sm:$0xff]  }
   0x4   :  { %1518 = vmatpush3.bf16.msra.mxu1 %v1570_v0  ;;  %1533 = vmatprep.mubr.bf16.mxu1 %v1578_v4  ;;  %v1574_v5 = vld [vmem:[%s2405_s5 + $0x20] sm:$0xff]   ;;  %v1583_v7 = vld [vmem:[%s2403_s3 + $0x8] sm:$0xff]   ;;  %v1584_v9 = vld [vmem:[%s2403_s3 + $0x10] sm:$0xff]  }
   0x5   :  { %1519 = vmatprep.subr.bf16.mxu1 %v1571_v1  ;;  %v1582_v6 = vld [vmem:[%s2403_s3] sm:$0xff]   ;;  %v1575_v8 = vld [vmem:[%s2405_s5 + $0x28] sm:$0xff]   ;;  %v1576_v10 = vld [vmem:[%s2405_s5 + $0x30] sm:$0xff]  }
   0x6   :  { %1493 = vmatprep.subr.bf16.mxu0 %v1582_v6  ;;  %v1585_v11 = vld [vmem:[%s2403_s3 + $0x18] sm:$0xff]   ;;  %v1586_v14 = vld [vmem:[%s2403_s3 + $0x20] sm:$0xff]   ;;  %v1587_v15 = vld [vmem:[%s2403_s3 + $0x28] sm:$0xff]  }
   0x7   :  { %1494 = vmatpush3.bf16.msra.mxu0 %v1582_v6  ;;  %v1577_v13 = vld [vmem:[%s2405_s5 + $0x38] sm:$0xff]   ;;  %v1579_v16 = vld [vmem:[%s2401_s1 + $0x8] sm:$0xff]   ;;  %v1580_v17 = vld [vmem:[%s2401_s1 + $0x10] sm:$0xff]  }
   0x8   :  { %1520 = vmatpush3.bf16.msra.mxu1 %v1571_v1  ;;  %1495 = vmatprep.subr.bf16.mxu0 %v1583_v7  ;;  %v1590_v12 = vld [vmem:[%s2419_s17] sm:$0xff]   ;;  %v1588_v18 = vld [vmem:[%s2403_s3 + $0x30] sm:$0xff]   ;;  %v1589_v19 = vld [vmem:[%s2403_s3 + $0x38] sm:$0xff]  }
   0x9   :  { %1521 = vmatprep.subr.bf16.mxu1 %v1572_v2  ;;  %1509 = vmatprep.mubr.bf16.mxu0 %v1590_v12  ;;  %v1581_v20 = vld [vmem:[%s2401_s1 + $0x18] sm:$0xff]   ;;  %v1594_v21 = vld [vmem:[%s2407_s7 + $0x4] ss:$8 sps:$4 sm:$0xff]   ;;  %v1592_v23 = vld [vmem:[%s2407_s7] ss:$8 sps:$4 sm:$0xff]  }
   0xa   :  { %v1591_v22 = vld [vmem:[%s2419_s17 + $0x8] sm:$0xff]   ;;  %v1601_v24 = vld [vmem:[%s2419_s17 + $0x10] sm:$0xff]  }
   0xb   :  { %1496 = vmatpush3.bf16.msra.mxu0 %v1583_v7  ;;  %v1597_v25 = vld [vmem:[%s2407_s7 + $0x14] ss:$8 sps:$4 sm:$0xff]   ;;  %v1595_v26 = vld [vmem:[%s2407_s7 + $0x10] ss:$8 sps:$4 sm:$0xff]   ;;  %v1600_v27 = vld [vmem:[%s2407_s7 + $0x24] ss:$8 sps:$4 sm:$0xff]  }
   0xc   :  { %1522 = vmatpush3.bf16.msra.mxu1 %v1572_v2  ;;  %1497 = vmatprep.subr.bf16.mxu0 %v1584_v9 }
   0xd   :  { %1523 = vmatprep.subr.bf16.mxu1 %v1573_v3 }
   0xf   :  { %1498 = vmatpush3.bf16.msra.mxu0 %v1584_v9 }
  0x10   :  { %1524 = vmatpush3.bf16.msra.mxu1 %v1573_v3  ;;  %1499 = vmatprep.subr.bf16.mxu0 %v1585_v11 }
  0x11   :  { %1525 = vmatprep.subr.bf16.mxu1 %v1574_v5 }
  0x13   :  { %1500 = vmatpush3.bf16.msra.mxu0 %v1585_v11 }
  0x14   :  { %1526 = vmatpush3.bf16.msra.mxu1 %v1574_v5  ;;  %1501 = vmatprep.subr.bf16.mxu0 %v1586_v14 }
  0x15   :  { %1527 = vmatprep.subr.bf16.mxu1 %v1575_v8 }
  0x17   :  { %1502 = vmatpush3.bf16.msra.mxu0 %v1586_v14 }
  0x18   :  { %1528 = vmatpush3.bf16.msra.mxu1 %v1575_v8  ;;  %1503 = vmatprep.subr.bf16.mxu0 %v1587_v15 }
  0x19   :  { %1529 = vmatprep.subr.bf16.mxu1 %v1576_v10 }
  0x1b   :  { %1504 = vmatpush3.bf16.msra.mxu0 %v1587_v15 }
  0x1c   :  { %1530 = vmatpush3.bf16.msra.mxu1 %v1576_v10  ;;  %1505 = vmatprep.subr.bf16.mxu0 %v1588_v18 }
  0x1d   :  { %1531 = vmatprep.subr.bf16.mxu1 %v1577_v13 }
  0x1f   :  { %1506 = vmatpush3.bf16.msra.mxu0 %v1588_v18 }
  0x20   :  { %1532 = vmatpush3.bf16.msra.mxu1 %v1577_v13  ;;  %1507 = vmatprep.subr.bf16.mxu0 %v1589_v19 }
  0x23   :  { %1534 = vmatmul.mubr.bf16.vlgmr.msra.gmra.mrb[0].mxu1 %v1579_v16  ;;  %1508 = vmatpush3.bf16.msra.mxu0 %v1589_v19 }
  0x24   :  { %1537 = vmatprep.mubr.bf16.mxu1 %v1580_v17  ;;  %519 = vmatprep.subr.bf16.mxu0 %v1594_v21 }
  0x26   :  { %1510 = vmatmul.mubr.bf16.vlgmr.msra.gmra.mrb[0].mxu0 %v1591_v22 }
  0x27   :  { %520 = vmatpush1.bf16.msra.mxu0 %v1592_v23  ;;  %1513 = vmatprep.mubr.bf16.mxu0 %v1601_v24 }
  0x28   :  { %521 = vmatprep.subr.bf16.mxu0 %v1597_v25 }
  0x2b   :  { %1538 = vmatmul.mubr.bf16.gmra.mrb[4].mxu1 %v1581_v20 }
  0x2c   :  { %23 = vsyncpa [#allocation5], 0  ;;  %v1602_v28 = vld [vmem:[%s2419_s17 + $0x18] sm:$0xff]   ;;  %522 = vmatpush1.bf16.msra.mxu0 %v1595_v26  ;;  %v1598_v29 = vld [vmem:[%s2407_s7 + $0x20] ss:$8 sps:$4 sm:$0xff]   ;;  %v1786_v40 = vmov 0  }
  0x2d   :  { %523 = vmatprep.subr.bf16.mxu0 %v1600_v27  ;;  %v1605_v30 = vld [vmem:[%s2407_s7 + $0x34] ss:$8 sps:$4 sm:$0xff]   ;;  %v1603_v31 = vld [vmem:[%s2407_s7 + $0x30] ss:$8 sps:$4 sm:$0xff]   ;;  %v1608_v32 = vld [vmem:[%s2407_s7 + $0x44] ss:$8 sps:$4 sm:$0xff]  }
  0x2e   :  { %1514 = vmatmul.mubr.bf16.gmra.mrb[4].mxu0 %v1602_v28  ;;  %v1606_v33 = vld [vmem:[%s2407_s7 + $0x40] ss:$8 sps:$4 sm:$0xff]   ;;  %v1611_v34 = vld [vmem:[%s2407_s7 + $0x54] ss:$8 sps:$4 sm:$0xff]   ;;  %v1609_v35 = vld [vmem:[%s2407_s7 + $0x50] ss:$8 sps:$4 sm:$0xff]  }
  0x2f   :  { %v1614_v36 = vld [vmem:[%s2407_s7 + $0x64] ss:$8 sps:$4 sm:$0xff]   ;;  %v1612_v37 = vld [vmem:[%s2407_s7 + $0x60] ss:$8 sps:$4 sm:$0xff]   ;;  %v1617_v38 = vld [vmem:[%s2407_s7 + $0x74] ss:$8 sps:$4 sm:$0xff]   ;;  %551 = vmatprep.mubr.bf16.mxu0 %v1786_v40 }
  0x30   :  { %524 = vmatpush1.bf16.msra.mxu0 %v1598_v29  ;;  %v1615_v39 = vld [vmem:[%s2407_s7 + $0x70] ss:$8 sps:$4 sm:$0xff]   ;;  %v1620_v41 = vld [vmem:[%s2411_s11 + $0x4] ss:$8 sps:$4 sm:$0xff]   ;;  %v1387_v45 = vld [vmem:[%s2406_s6] ss:$0 sm:$0xff] }
  0x31   :  { %525 = vmatprep.subr.bf16.mxu0 %v1605_v30  ;;  %v1642_v42 = vld [vmem:[%s2409_s9] sm:$0xff]   ;;  %v1643_v43 = vld [vmem:[%s2409_s9 + $0x8] sm:$0xff]   ;;  %v1644_v44 = vld [vmem:[%s2409_s9 + $0x10] sm:$0xff]  }
  0x32   :  { %1541 = vmatprep.subr.bf16.mxu1 %v1642_v42  ;;  %v1618_v59 = vld [vmem:[%s2411_s11] ss:$8 sps:$4 sm:$0xff]   ;;  %v1623_v62 = vld [vmem:[%s2411_s11 + $0x14] ss:$8 sps:$4 sm:$0xff]   ;;  %v1621_v6 = vld [vmem:[%s2411_s11 + $0x10] ss:$8 sps:$4 sm:$0xff]  }
  0x33   :  { %1542 = vmatpush3.bf16.msra.mxu1 %v1642_v42  ;;  %v1374_v7 = vld [vmem:[%s2404_s4] ss:$0 sm:$0xff]  ;;  %v1626_v10 = vld [vmem:[%s2411_s11 + $0x24] ss:$8 sps:$4 sm:$0xff]   ;;  %v1629_v24 = vld [vmem:[%s2411_s11 + $0x34] ss:$8 sps:$4 sm:$0xff]  }
  0x34   :  { %526 = vmatpush1.bf16.msra.mxu0 %v1603_v31  ;;  %1543 = vmatprep.subr.bf16.mxu1 %v1643_v43  ;;  %v1624_v19 = vld [vmem:[%s2411_s11 + $0x20] ss:$8 sps:$4 sm:$0xff]   ;;  %v1627_v29 = vld [vmem:[%s2411_s11 + $0x30] ss:$8 sps:$4 sm:$0xff]   ;;  %v1632_v31 = vld [vmem:[%s2411_s11 + $0x44] ss:$8 sps:$4 sm:$0xff]  }
  0x35   :  { %527 = vmatprep.subr.bf16.mxu0 %v1608_v32 }
  0x37   :  { %1544 = vmatpush3.bf16.msra.mxu1 %v1643_v43  ;;  %v1635_v43 = vld [vmem:[%s2411_s11 + $0x54] ss:$8 sps:$4 sm:$0xff]  }
  0x38   :  { %528 = vmatpush1.bf16.msra.mxu0 %v1606_v33  ;;  %1545 = vmatprep.subr.bf16.mxu1 %v1644_v44 }
  0x39   :  { %529 = vmatprep.subr.bf16.mxu0 %v1611_v34 }
  0x3b   :  { %1546 = vmatpush3.bf16.msra.mxu1 %v1644_v44 }
  0x3c   :  { %530 = vmatpush1.bf16.msra.mxu0 %v1609_v35 }
  0x3d   :  { %531 = vmatprep.subr.bf16.mxu0 %v1614_v36 }
  0x40   :  { %532 = vmatpush1.bf16.msra.mxu0 %v1612_v37 }
  0x41   :  { %533 = vmatprep.subr.bf16.mxu0 %v1617_v38  ;;  %v1630_v38 = vld [vmem:[%s2411_s11 + $0x40] ss:$8 sps:$4 sm:$0xff]  }
  0x44   :  { %534 = vmatpush1.bf16.msra.mxu0 %v1615_v39 }
  0x45   :  { %876 = vmatprep.subr.bf16.mxu0 %v1620_v41 }
  0xf6   :  { %v1535_v46 = vpop.f32.mrb[0].mxu1 }
  0xf7   :  { %v377_v47 = vadd.f32 %v1535_v46, %v1387_v45  ;;  %v368_v48 = vpop.f32.mrb[1].mxu1 }
  0xf8   :  { %v369_v49 = vadd.f32 %v1387_v45, %v368_v48  ;;  %v1536_v50 = vpop.f32.mrb[2].mxu1  ;;  %v1633_v48 = vld [vmem:[%s2411_s11 + $0x50] ss:$8 sps:$4 sm:$0xff]  }
  0xf9   :  { %v380_v51 = vadd.f32 %v1536_v50, %v1387_v45  ;;  %v371_v52 = vpop.f32.mrb[3].mxu1  ;;  %v401_v54 = vmax.f32 %v377_v47, 0.0  ;;  %v1511_v11 = vpop.f32.mrb[0].mxu0  ;;  %v1638_v50 = vld [vmem:[%s2411_s11 + $0x64] ss:$8 sps:$4 sm:$0xff]  }
  0xfa   :  { %v372_v53 = vadd.f32 %v1387_v45, %v371_v52  ;;  %v399_v56 = vmax.f32 %v369_v49, 0.0  ;;  %v201_v13 = vadd.f32 %v1511_v11, %v1374_v7  ;;  %v192_v14 = vpop.f32.mrb[1].mxu0  ;;  %v1636_v52 = vld [vmem:[%s2411_s11 + $0x60] ss:$8 sps:$4 sm:$0xff]  }
  0xfb   :  { %v402_v55 = vmax.f32 %v380_v51, 0.0  ;;  %v193_v16 = vadd.f32 %v1374_v7, %v192_v14  ;;  %v1512_v17 = vpop.f32.mrb[2].mxu0 }
  0xfc   :  { %v400_v57 = vmax.f32 %v372_v53, 0.0  ;;  %v225_v20 = vmax.f32 %v201_v13, 0.0  ;;  %v204_v21 = vadd.f32 %v1512_v17, %v1374_v7  ;;  %v195_v22 = vpop.f32.mrb[3].mxu0  ;;  %v1641_v53 = vld [vmem:[%s2411_s11 + $0x74] ss:$8 sps:$4 sm:$0xff]  }
  0xfd   :  { %v408_v58 = vpack.c.bf16 %v402_v55, %v401_v54  ;;  %v223_v25 = vmax.f32 %v193_v16, 0.0  ;;  %v196_v26 = vadd.f32 %v1374_v7, %v195_v22  ;;  %v1639_v54 = vld [vmem:[%s2411_s11 + $0x70] ss:$8 sps:$4 sm:$0xff]  }
  0xfe   :  { %v407_v60 = vpack.c.bf16 %v400_v57, %v399_v56  ;;  %v1539_v61 = vpop.f32.mrb[4].mxu1  ;;  %v226_v27 = vmax.f32 %v204_v21, 0.0  ;;  %v1645_v55 = vld [vmem:[%s2409_s9 + $0x18] sm:$0xff]   ;;  %v1646_v56 = vld [vmem:[%s2409_s9 + $0x20] sm:$0xff]   ;;  %v1647_v57 = vld [vmem:[%s2409_s9 + $0x28] sm:$0xff]  }
  0xff   :  { %v393_v63 = vadd.f32 %v1539_v61, %v1387_v45  ;;  %v384_v0 = vpop.f32.mrb[5].mxu1  ;;  %v224_v28 = vmax.f32 %v196_v26, 0.0  ;;  %1547 = vmatprep.subr.bf16.mxu1 %v1645_v55  ;;  %v429_v61 = vlaneseq }
 0x100   :  { %552 = vmatmul.mubr.bf16.vlgmr.msra.gmra.mrb[8].mxu0 %v407_v60  ;;  %v385_v1 = vadd.f32 %v1387_v45, %v384_v0  ;;  %v1540_v2 = vpop.f32.mrb[6].mxu1  ;;  %v765_v30 = vpack.c.bf16 %v226_v27, %v225_v20  ;;  %1548 = vmatpush3.bf16.msra.mxu1 %v1645_v55  ;;  %v1652_v60 = vld [vmem:[%s2413_s13 + $0x4] ss:$8 sps:$4 sm:$0xff]   ;;  %v427_v0 = vld [vmem:[%s2408_s8] sm:$0x3]  ;;  %v594_v20 = vld [vmem:[%s2402_s2 + $0x10] sm:$0xff] }
 0x101   :  { %v405_v3 = vmax.f32 %v393_v63, 0.0  ;;  %v396_v4 = vadd.f32 %v1540_v2, %v1387_v45  ;;  %v387_v5 = vpop.f32.mrb[7].mxu1  ;;  %561 = vmatprep.mubr.bf16.mxu0 %v1786_v40  ;;  %877 = vmatpush1.bf16.msra.mxu0 %v1618_v59  ;;  %v764_v32 = vpack.c.bf16 %v224_v28, %v223_v25  ;;  %v1515_v33 = vpop.f32.mrb[4].mxu0  ;;  %v1649_v59 = vld [vmem:[%s2409_s9 + $0x38] sm:$0xff]   ;;  %v598_v55 = vld [vmem:[%s2402_s2 + $0x30] sm:$0xff] }
 0x102   :  { %v403_v8 = vmax.f32 %v385_v1, 0.0  ;;  %v388_v9 = vadd.f32 %v1387_v45, %v387_v5  ;;  %878 = vmatprep.subr.bf16.mxu0 %v1623_v62  ;;  %v217_v34 = vadd.f32 %v1515_v33, %v1374_v7  ;;  %v208_v35 = vpop.f32.mrb[5].mxu0  ;;  %1549 = vmatprep.subr.bf16.mxu1 %v1646_v56  ;;  %v430_v62 = vshrl.u32 %v429_v61, 7  ;;  %v595_v25 = vld [vmem:[%s2402_s2 + $0x18] sm:$0xff] }
 0x103   :  { %v406_v12 = vmax.f32 %v396_v4, 0.0  ;;  %v209_v36 = vadd.f32 %v1374_v7, %v208_v35  ;;  %v1516_v37 = vpop.f32.mrb[6].mxu0  ;;  %v596_v35 = vld [vmem:[%s2402_s2 + $0x20] sm:$0xff] }
 0x104   :  { %v404_v15 = vmax.f32 %v388_v9, 0.0  ;;  %v229_v39 = vmax.f32 %v217_v34, 0.0  ;;  %v220_v41 = vadd.f32 %v1516_v37, %v1374_v7  ;;  %v211_v42 = vpop.f32.mrb[7].mxu0  ;;  %1550 = vmatpush3.bf16.msra.mxu1 %v1646_v56  ;;  %v2085_v63 = vsub.s32 1, %v430_v62  ;;  %v1656_v56 = vld [vmem:[%s2413_s13 + $0x20] ss:$8 sps:$4 sm:$0xff]  }
 0x105   :  { %v410_v18 = vpack.c.bf16 %v406_v12, %v405_v3  ;;  %879 = vmatpush1.bf16.msra.mxu0 %v1621_v6  ;;  %v227_v44 = vmax.f32 %v209_v36, 0.0  ;;  %v212_v45 = vadd.f32 %v1374_v7, %v211_v42  ;;  %1551 = vmatprep.subr.bf16.mxu1 %v1647_v57  ;;  %v2090_v1 = vsub.s32 0, %v430_v62  ;;  %v592_v6 = vld [vmem:[%s2402_s2] sm:$0xff]  ;;  %v599_v62 = vld [vmem:[%s2402_s2 + $0x38] sm:$0xff] }
 0x106   :  { %v409_v23 = vpack.c.bf16 %v404_v15, %v403_v8  ;;  %880 = vmatprep.subr.bf16.mxu0 %v1626_v10  ;;  %v230_v46 = vmax.f32 %v220_v41, 0.0  ;;  %v2093_v2 = vrot.slane %v427_v0, %v2085_v63  ;;  %v593_v10 = vld [vmem:[%s2402_s2 + $0x8] sm:$0xff]  ;;  %v1655_v41 = vld [vmem:[%s2413_s13 + $0x14] ss:$8 sps:$4 sm:$0xff]  }
 0x107   :  { %v228_v47 = vmax.f32 %v212_v45, 0.0  ;;  %v2096_v3 = vrot.slane %v427_v0, %v2090_v1  ;;  %v1650_v36 = vld [vmem:[%s2413_s13] ss:$8 sps:$4 sm:$0xff]  }
 0x108   :  { %562 = vmatmul.mubr.bf16.gmra.mrb[12].mxu0 %v408_v58  ;;  %v767_v49 = vpack.c.bf16 %v230_v46, %v229_v39  ;;  %1552 = vmatpush3.bf16.msra.mxu1 %v1647_v57  ;;  %v1648_v58 = vld [vmem:[%s2409_s9 + $0x30] sm:$0xff]  }
 0x109   :  { %571 = vmatprep.mubr.bf16.mxu0 %v1786_v40  ;;  %881 = vmatpush1.bf16.msra.mxu0 %v1624_v19  ;;  %v766_v51 = vpack.c.bf16 %v228_v47, %v227_v44  ;;  %v1653_v47 = vld [vmem:[%s2413_s13 + $0x10] ss:$8 sps:$4 sm:$0xff]  }
 0x10a   :  { %882 = vmatprep.subr.bf16.mxu0 %v1629_v24  ;;  %1553 = vmatprep.subr.bf16.mxu1 %v1648_v58 }
 0x10c   :  { %1554 = vmatpush3.bf16.msra.mxu1 %v1648_v58 }
 0x10d   :  { %883 = vmatpush1.bf16.msra.mxu0 %v1627_v29  ;;  %1555 = vmatprep.subr.bf16.mxu1 %v1649_v59 }
 0x10e   :  { %884 = vmatprep.subr.bf16.mxu0 %v1632_v31 }
 0x110   :  { %572 = vmatmul.mubr.bf16.gmra.mrb[16].mxu0 %v409_v23  ;;  %1556 = vmatpush3.bf16.msra.mxu1 %v1649_v59 }
 0x111   :  { %581 = vmatprep.mubr.bf16.mxu0 %v1786_v40  ;;  %885 = vmatpush1.bf16.msra.mxu0 %v1630_v38 }
 0x112   :  { %886 = vmatprep.subr.bf16.mxu0 %v1635_v43  ;;  %1061 = vmatprep.subr.bf16.mxu1 %v1652_v60  ;;  %v597_v43 = vld [vmem:[%s2402_s2 + $0x28] sm:$0xff]  ;;  %v1661_v60 = vld [vmem:[%s2413_s13 + $0x34] ss:$8 sps:$4 sm:$0xff]  }
 0x115   :  { %887 = vmatpush1.bf16.msra.mxu0 %v1633_v48 }
 0x116   :  { %888 = vmatprep.subr.bf16.mxu0 %v1638_v50 }
 0x118   :  { %582 = vmatmul.mubr.bf16.gmra.mrb[20].mxu0 %v410_v18 }
 0x119   :  { %889 = vmatpush1.bf16.msra.mxu0 %v1636_v52  ;;  %908 = vmatprep.mubr.bf16.mxu0 %v1786_v40 }
 0x11a   :  { %890 = vmatprep.subr.bf16.mxu0 %v1641_v53 }
 0x11d   :  { %891 = vmatpush1.bf16.msra.mxu0 %v1639_v54 }
 0x120   :  { %909 = vmatmul.mubr.bf16.vlgmr.msra.gmra.mrb[24].mxu0 %v764_v32 }
 0x121   :  { %918 = vmatprep.mubr.bf16.mxu0 %v1786_v40 }
 0x128   :  { %919 = vmatmul.mubr.bf16.gmra.mrb[28].mxu0 %v765_v30 }
 0x129   :  { %928 = vmatprep.mubr.bf16.mxu0 %v1786_v40 }
 0x130   :  { %929 = vmatmul.mubr.bf16.gmra.mrb[32].mxu0 %v766_v51  ;;  %v1658_v51 = vld [vmem:[%s2413_s13 + $0x24] ss:$8 sps:$4 sm:$0xff]  }
 0x131   :  { %938 = vmatprep.mubr.bf16.mxu0 %v1786_v40 }
 0x138   :  { %939 = vmatmul.mubr.bf16.gmra.mrb[36].mxu0 %v767_v49 }
 0x1d3   :  { %v553_v4 = vpop.f32.mrb[8].mxu0 }
 0x1d4   :  { %v555_v5 = vpop.f32.mrb[9].mxu0  ;;  %v554_v11 = vadd.f32 %v553_v4, %v2096_v3 }
 0x1d5   :  { %v556_v7 = vadd.f32 %v555_v5, %v2093_v2  ;;  %v557_v8 = vpop.f32.mrb[10].mxu0 }
 0x1d6   :  { %v559_v9 = vpop.f32.mrb[11].mxu0  ;;  %v558_v15 = vadd.f32 %v557_v8, %v2096_v3 }
 0x1d7   :  { %v600_v12 = vmul.f32 %v592_v6, %v556_v7  ;;  %v560_v13 = vadd.f32 %v559_v9, %v2093_v2  ;;  %v1659_v6 = vld [vmem:[%s2413_s13 + $0x30] ss:$8 sps:$4 sm:$0xff]  }
 0x1d9   :  { %v608_v14 = vadd.f32 %v600_v12, %v554_v11  ;;  %v601_v16 = vmul.f32 %v593_v10, %v560_v13  ;;  %v1664_v10 = vld [vmem:[%s2413_s13 + $0x44] ss:$8 sps:$4 sm:$0xff]  }
 0x1db   :  { %v609_v17 = vadd.f32 %v601_v16, %v558_v15  ;;  %v563_v18 = vpop.f32.mrb[12].mxu0 }
 0x1dc   :  { %v565_v19 = vpop.f32.mrb[13].mxu0  ;;  %v564_v26 = vadd.f32 %v563_v18, %v2096_v3 }
 0x1dd   :  { %v566_v21 = vadd.f32 %v565_v19, %v2093_v2  ;;  %v567_v22 = vpop.f32.mrb[14].mxu0  ;;  %v616_v23 = vpack.c.bf16 %v609_v17, %v608_v14  ;;  %v1665_v17 = vld [vmem:[%s2413_s13 + $0x50] ss:$8 sps:$4 sm:$0xff]  }
 0x1de   :  { %v569_v24 = vpop.f32.mrb[15].mxu0  ;;  %v568_v30 = vadd.f32 %v567_v22, %v2096_v3 }
 0x1df   :  { %v602_v27 = vmul.f32 %v594_v20, %v566_v21  ;;  %v570_v28 = vadd.f32 %v569_v24, %v2093_v2  ;;  %1557 = vmatprep.mubr.bf16.mxu1 %v616_v23 }
 0x1e1   :  { %v610_v29 = vadd.f32 %v602_v27, %v564_v26  ;;  %v603_v31 = vmul.f32 %v595_v25, %v570_v28 }
 0x1e3   :  { %v611_v32 = vadd.f32 %v603_v31, %v568_v30  ;;  %v573_v33 = vpop.f32.mrb[16].mxu0  ;;  %v1670_v30 = vld [vmem:[%s2413_s13 + $0x64] ss:$8 sps:$4 sm:$0xff]   ;;  %v1668_v31 = vld [vmem:[%s2413_s13 + $0x60] ss:$8 sps:$4 sm:$0xff]  }
 0x1e4   :  { %v575_v34 = vpop.f32.mrb[17].mxu0  ;;  %v574_v44 = vadd.f32 %v573_v33, %v2096_v3  ;;  %v1671_v33 = vld [vmem:[%s2413_s13 + $0x70] ss:$8 sps:$4 sm:$0xff]  }
 0x1e5   :  { %v617_v37 = vpack.c.bf16 %v611_v32, %v610_v29  ;;  %v576_v38 = vadd.f32 %v575_v34, %v2093_v2  ;;  %v577_v39 = vpop.f32.mrb[18].mxu0  ;;  %v1673_v32 = vld [vmem:[%s2413_s13 + $0x74] ss:$8 sps:$4 sm:$0xff]   ;;  %v1416_v34 = vld [vmem:[%s2410_s10] ss:$0 sm:$0xff] }
 0x1e6   :  { %v579_v42 = vpop.f32.mrb[19].mxu0  ;;  %v578_v49 = vadd.f32 %v577_v39, %v2096_v3 }
 0x1e7   :  { %v604_v45 = vmul.f32 %v596_v35, %v576_v38  ;;  %v580_v46 = vadd.f32 %v579_v42, %v2093_v2  ;;  %1558 = vmatmul.mubr.bf16.vlgmr.msra.gmra.mrb[8].mxu1 %v617_v37 }
 0x1e8   :  { %1062 = vmatpush1.bf16.msra.mxu1 %v1650_v36 }
 0x1e9   :  { %v612_v48 = vadd.f32 %v604_v45, %v574_v44  ;;  %v605_v50 = vmul.f32 %v597_v43, %v580_v46  ;;  %1063 = vmatprep.subr.bf16.mxu1 %v1655_v41 }
 0x1eb   :  { %v613_v52 = vadd.f32 %v605_v50, %v578_v49  ;;  %v583_v53 = vpop.f32.mrb[20].mxu0 }
 0x1ec   :  { %v585_v54 = vpop.f32.mrb[21].mxu0  ;;  %1064 = vmatpush1.bf16.msra.mxu1 %v1653_v47  ;;  %v584_v0 = vadd.f32 %v583_v53, %v2096_v3 }
 0x1ed   :  { %v586_v57 = vadd.f32 %v585_v54, %v2093_v2  ;;  %v587_v58 = vpop.f32.mrb[22].mxu0  ;;  %v618_v59 = vpack.c.bf16 %v613_v52, %v612_v48  ;;  %1065 = vmatprep.subr.bf16.mxu1 %v1658_v51 }
 0x1ee   :  { %v589_v61 = vpop.f32.mrb[23].mxu0  ;;  %v588_v8 = vadd.f32 %v587_v58, %v2096_v3  ;;  %v1667_v3 = vld [vmem:[%s2413_s13 + $0x54] ss:$8 sps:$4 sm:$0xff]  }
 0x1ef   :  { %v606_v4 = vmul.f32 %v598_v55, %v586_v57  ;;  %v590_v5 = vadd.f32 %v589_v61, %v2093_v2  ;;  %1561 = vmatprep.mubr.bf16.mxu1 %v618_v59  ;;  %v1662_v2 = vld [vmem:[%s2413_s13 + $0x40] ss:$8 sps:$4 sm:$0xff]  }
 0x1f0   :  { %1066 = vmatpush1.bf16.msra.mxu1 %v1656_v56 }
 0x1f1   :  { %v614_v7 = vadd.f32 %v606_v4, %v584_v0  ;;  %v607_v9 = vmul.f32 %v599_v62, %v590_v5  ;;  %1067 = vmatprep.subr.bf16.mxu1 %v1661_v60  ;;  %v784_v4 = vld [vmem:[%s2412_s12] sm:$0x3]  ;;  %s1787_s12 = smov [#allocation2]  }
 0x1f2   :  { %v969_v5 = vld [vmem:[%s2414_s14] sm:$0x3]  ;;  %s1347_s14 = sshll.u32 %s1787_s12, 4  ;;  %s1348_s14 = int_to_ptr.vmem [resolvable:$true] %s1347_s14 }
 0x1f3   :  { %v615_v11 = vadd.f32 %v607_v9, %v588_v8  ;;  %v2162_v12 = vpop.f32.mrb[24].mxu0  ;;  %v2235_v8 = vrot.slane %v969_v5, %v2085_v63  ;;  %s1738_s29 = scalar_lea.vmem %s1348_s14, 1024  ;;  %p1743_p1 = scmp.lt.s32.totalorder %s1348_s14, %s1348_s14 }
 0x1f4   :  { %v2164_v13 = vpop.f32.mrb[25].mxu0  ;;  %1068 = vmatpush1.bf16.msra.mxu1 %v1659_v6  ;;  %v2229_v6 = vrot.slane %v784_v4, %v2090_v1  ;;  %p1739_p0 = scmp.ne.s32.totalorder %s1348_s14, %s1738_s29  ;;  %p1744_p2 = scmp.lt.s32.totalorder %s1738_s29, %s1738_s29 }
 0x1f5   :  { %v619_v14 = vpack.c.bf16 %v615_v11, %v614_v7  ;;  %v2169_v15 = vpop.f32.mrb[26].mxu0  ;;  %1069 = vmatprep.subr.bf16.mxu1 %v1664_v10  ;;  %v2232_v7 = vrot.slane %v969_v5, %v2090_v1 }
 0x1f6   :  { %v2174_v16 = vpop.f32.mrb[27].mxu0  ;;  %p1745_p3 = por %p1744_p2, %p1743_p1 }
 0x1f7   :  { %1562 = vmatmul.mubr.bf16.gmra.mrb[12].mxu1 %v619_v14 }
 0x1f8   :  { %1070 = vmatpush1.bf16.msra.mxu1 %v1662_v2  ;;  %1093 = vmatprep.mubr.bf16.mxu1 %v1786_v40  ;;  %p1746_p4 = pnand %p1745_p3, %p1739_p0 }
 0x1f9   :  { %1071 = vmatprep.subr.bf16.mxu1 %v1667_v3  ;;  %v915_v3 = vadd.f32 %v2169_v15, %v2229_v6 }
 0x1fb   :  { %v2180_v18 = vpop.f32.mrb[28].mxu0 }
 0x1fc   :  { %v2182_v19 = vpop.f32.mrb[29].mxu0  ;;  %1072 = vmatpush1.bf16.msra.mxu1 %v1665_v17  ;;  %v921_v15 = vadd.f32 %v2180_v18, %v2229_v6 }
 0x1fd   :  { %v2184_v20 = vpop.f32.mrb[30].mxu0  ;;  %1073 = vmatprep.subr.bf16.mxu1 %v1670_v30 }
 0x1fe   :  { %v2186_v21 = vpop.f32.mrb[31].mxu0 }
 0x200   :  { %1074 = vmatpush1.bf16.msra.mxu1 %v1668_v31 }
 0x201   :  { %1075 = vmatprep.subr.bf16.mxu1 %v1673_v32 }
 0x203   :  { %v2188_v22 = vpop.f32.mrb[32].mxu0 }
 0x204   :  { %v2190_v23 = vpop.f32.mrb[33].mxu0  ;;  %1076 = vmatpush1.bf16.msra.mxu1 %v1671_v33 }
 0x205   :  { %v2192_v24 = vpop.f32.mrb[34].mxu0 }
 0x206   :  { %v2194_v25 = vpop.f32.mrb[35].mxu0 }
 0x20b   :  { %v2196_v26 = vpop.f32.mrb[36].mxu0 }
 0x20c   :  { %v2198_v27 = vpop.f32.mrb[37].mxu0 }
 0x20d   :  { %v2200_v28 = vpop.f32.mrb[38].mxu0 }
 0x20e   :  { %v2202_v29 = vpop.f32.mrb[39].mxu0 }
 0x2ba   :  { %v1559_v35 = vpop.f32.mrb[8].mxu1 }
 0x2bb   :  { %v734_v36 = vadd.f32 %v1559_v35, %v1416_v34  ;;  %v725_v37 = vpop.f32.mrb[9].mxu1 }
 0x2bc   :  { %v726_v38 = vadd.f32 %v1416_v34, %v725_v37  ;;  %v1560_v39 = vpop.f32.mrb[10].mxu1 }
 0x2bd   :  { %v737_v41 = vadd.f32 %v1560_v39, %v1416_v34  ;;  %v728_v42 = vpop.f32.mrb[11].mxu1  ;;  %v758_v44 = vmax.f32 %v734_v36, 0.0 }
 0x2be   :  { %v729_v43 = vadd.f32 %v1416_v34, %v728_v42  ;;  %v756_v46 = vmax.f32 %v726_v38, 0.0 }
 0x2bf   :  { %v759_v45 = vmax.f32 %v737_v41, 0.0 }
 0x2c0   :  { %v757_v47 = vmax.f32 %v729_v43, 0.0 }
 0x2c1   :  { %v950_v48 = vpack.c.bf16 %v759_v45, %v758_v44 }
 0x2c2   :  { %v949_v49 = vpack.c.bf16 %v757_v47, %v756_v46 }
 0x2c4   :  { %1094 = vmatmul.mubr.bf16.vlgmr.msra.gmra.mrb[16].mxu1 %v949_v49 }
 0x2c5   :  { %1103 = vmatprep.mubr.bf16.mxu1 %v1786_v40 }
 0x2ca   :  { %v1563_v50 = vpop.f32.mrb[12].mxu1 }
 0x2cb   :  { %v750_v51 = vadd.f32 %v1563_v50, %v1416_v34  ;;  %v741_v52 = vpop.f32.mrb[13].mxu1 }
 0x2cc   :  { %v742_v53 = vadd.f32 %v1416_v34, %v741_v52  ;;  %v1564_v54 = vpop.f32.mrb[14].mxu1  ;;  %1104 = vmatmul.mubr.bf16.gmra.mrb[20].mxu1 %v950_v48  ;;  %v925_v48 = vadd.f32 %v2184_v20, %v2229_v6  ;;  %v2266_v20 = vrot.slane %v784_v4, %v2085_v63 }
 0x2cd   :  { %v753_v55 = vadd.f32 %v1564_v54, %v1416_v34  ;;  %v744_v56 = vpop.f32.mrb[15].mxu1  ;;  %1113 = vmatprep.mubr.bf16.mxu1 %v1786_v40  ;;  %v762_v58 = vmax.f32 %v750_v51, 0.0 }
 0x2ce   :  { %v745_v57 = vadd.f32 %v1416_v34, %v744_v56  ;;  %v760_v60 = vmax.f32 %v742_v53, 0.0 }
 0x2cf   :  { %v763_v59 = vmax.f32 %v753_v55, 0.0 }
 0x2d0   :  { %v761_v61 = vmax.f32 %v745_v57, 0.0 }
 0x2d1   :  { %v952_v62 = vpack.c.bf16 %v763_v59, %v762_v58 }
 0x2d2   :  { %v951_v0 = vpack.c.bf16 %v761_v61, %v760_v60 }
 0x2d4   :  { %1114 = vmatmul.mubr.bf16.gmra.mrb[24].mxu1 %v951_v0 }
 0x2d5   :  { %1123 = vmatprep.mubr.bf16.mxu1 %v1786_v40  ;;  %v911_v40 = vadd.f32 %v2162_v12, %v2229_v6 }
 0x2dc   :  { %1124 = vmatmul.mubr.bf16.gmra.mrb[28].mxu1 %v952_v62  ;;  %v931_v62 = vadd.f32 %v2188_v22, %v2229_v6  ;;  %v935_v22 = vadd.f32 %v2192_v24, %v2229_v6  ;;  %v917_v24 = vadd.f32 %v2174_v16, %v2266_v20 }
 0x397   :  { %v1095_v9 = vpop.f32.mrb[16].mxu1 }
 0x398   :  { %v1096_v10 = vadd.f32 %v1095_v9, %v2232_v7  ;;  %v1097_v11 = vpop.f32.mrb[17].mxu1 }
 0x399   :  { %v2241_v2 = vadd.f32 %v1097_v11, %v2235_v8  ;;  %v1099_v14 = vpop.f32.mrb[18].mxu1 }
 0x39a   :  { %v1134_v17 = vadd.f32 %v1096_v10, %v911_v40  ;;  %v1100_v1 = vadd.f32 %v1099_v14, %v2232_v7  ;;  %v1101_v30 = vpop.f32.mrb[19].mxu1 }
 0x39b   :  { %v1214_v31 = vand.u32 2147483647, %v2241_v2  ;;  %v2248_v32 = vadd.f32 %v1101_v30, %v2235_v8 }
 0x39c   :  { %v1142_v12 = vsub.f32 0.0, %v1134_v17  ;;  %v1135_v33 = vadd.f32 %v1100_v1, %v915_v3 }
 0x39d   :  { %v1222_v34 = vsub.f32 0.0, %v1214_v31  ;;  %v1215_v35 = vand.u32 2147483647, %v2248_v32 }
 0x39e   :  { %v1150_v36 = vmul.f32 1.442695, %v1142_v12  ;;  %v1143_v37 = vsub.f32 0.0, %v1135_v33  ;;  %v913_v12 = vadd.f32 %v2164_v13, %v2266_v20  ;;  %v2294_v13 = vadd.f32 %v2186_v21, %v2266_v20 }
 0x39f   :  { %v1230_v38 = vmul.f32 1.442695, %v1222_v34  ;;  %v1223_v39 = vsub.f32 0.0, %v1215_v35  ;;  %v1105_v41 = vpop.f32.mrb[20].mxu1 }
 0x3a0   :  { %1674 = vpow2.f32 %v1150_v36  ;;  %v1152_v42 = vmul.f32 1.442695, %v1143_v37  ;;  %v1106_v43 = vadd.f32 %v1105_v41, %v2232_v7  ;;  %v1107_v44 = vpop.f32.mrb[21].mxu1 }
 0x3a1   :  { %1676 = vpow2.f32 %v1230_v38  ;;  %v1232_v45 = vmul.f32 1.442695, %v1223_v39  ;;  %v2255_v46 = vadd.f32 %v1107_v44, %v2235_v8  ;;  %v1109_v47 = vpop.f32.mrb[22].mxu1  ;;  %v2289_v39 = vadd.f32 %v2182_v19, %v2266_v20 }
 0x3a2   :  { %1678 = vpow2.f32 %v1152_v42  ;;  %v1136_v49 = vadd.f32 %v1106_v43, %v921_v15  ;;  %v1110_v50 = vadd.f32 %v1109_v47, %v2232_v7  ;;  %v1111_v51 = vpop.f32.mrb[23].mxu1  ;;  %v941_v15 = vadd.f32 %v2196_v26, %v2229_v6 }
 0x3a3   :  { %1680 = vpow2.f32 %v1232_v45  ;;  %v1216_v18 = vand.u32 2147483647, %v2255_v46  ;;  %v2262_v52 = vadd.f32 %v1111_v51, %v2235_v8  ;;  %v2301_v47 = vadd.f32 %v2200_v28, %v2229_v6 }
 0x3a4   :  { %v1144_v53 = vsub.f32 0.0, %v1136_v49  ;;  %v1137_v54 = vadd.f32 %v1110_v50, %v925_v48  ;;  %v1206_v48 = vmax.f32 %v2241_v2, 0.0  ;;  %v1207_v6 = vmax.f32 %v2248_v32, 0.0 }
 0x3a5   :  { %v1224_v55 = vsub.f32 0.0, %v1216_v18  ;;  %v1217_v56 = vand.u32 2147483647, %v2262_v52 }
 0x3a6   :  { %v1154_v57 = vmul.f32 1.442695, %v1144_v53  ;;  %v1145_v58 = vsub.f32 0.0, %v1137_v54 }
 0x3a7   :  { %v1234_v59 = vmul.f32 1.442695, %v1224_v55  ;;  %v1225_v60 = vsub.f32 0.0, %v1217_v56  ;;  %v1115_v61 = vpop.f32.mrb[24].mxu1 }
 0x3a8   :  { %1682 = vpow2.f32 %v1154_v57  ;;  %v1156_v0 = vmul.f32 1.442695, %v1145_v58  ;;  %v1116_v5 = vadd.f32 %v1115_v61, %v2232_v7  ;;  %v1117_v9 = vpop.f32.mrb[25].mxu1 }
 0x3a9   :  { %1684 = vpow2.f32 %v1234_v59  ;;  %v1236_v40 = vmul.f32 1.442695, %v1225_v60  ;;  %v2272_v10 = vadd.f32 %v1117_v9, %v2235_v8  ;;  %v1119_v11 = vpop.f32.mrb[26].mxu1 }
 0x3aa   :  { %v1675_v14 = vpop.eup %1674  ;;  %1686 = vpow2.f32 %v1156_v0  ;;  %v1138_v63 = vadd.f32 %v1116_v5, %v931_v62  ;;  %v1120_v4 = vadd.f32 %v1119_v11, %v2232_v7  ;;  %v1121_v3 = vpop.f32.mrb[27].mxu1 }
 0x3ab   :  { %v2275_v17 = vpop.eup %1676  ;;  %v1166_v1 = vadd.f32 1.0, %v1675_v14  ;;  %1688 = vpow2.f32 %v1236_v40  ;;  %v1218_v30 = vand.u32 2147483647, %v2272_v10  ;;  %v2305_v21 = vadd.f32 %v1121_v3, %v2235_v8 }
 0x3ac   :  { %v1679_v31 = vpop.eup %1678  ;;  %v1246_v33 = vadd.f32 1.0, %v2275_v17  ;;  %v1146_v34 = vsub.f32 0.0, %v1138_v63  ;;  %v1139_v38 = vadd.f32 %v1120_v4, %v935_v22  ;;  %v1249_v44 = vmul.f32 -0.5, %v2275_v17 }
 0x3ad   :  { %v2283_v35 = vpop.eup %1680  ;;  %1690 = vrcp.f32 %v1166_v1  ;;  %v1167_v36 = vadd.f32 1.0, %v1679_v31  ;;  %v1226_v37 = vsub.f32 0.0, %v1218_v30  ;;  %v1252_v28 = vand.u32 2147483647, %v2275_v17 }
 0x3ae   :  { %1692 = vlog2.f32 %v1246_v33  ;;  %v1255_v41 = vadd.f32 1.0, %v2283_v35  ;;  %v1158_v42 = vmul.f32 1.442695, %v1146_v34  ;;  %v1147_v45 = vsub.f32 0.0, %v1139_v38 }
 0x3af   :  { %1694 = vrcp.f32 %v1167_v36  ;;  %v1125_v43 = vpop.f32.mrb[28].mxu1  ;;  %v1238_v16 = vmul.f32 1.442695, %v1226_v37  ;;  %v1258_v50 = vmul.f32 -0.5, %v2283_v35  ;;  %v1219_v55 = vand.u32 2147483647, %v2305_v21 }
 0x3b0   :  { %1696 = vlog2.f32 %v1255_v41  ;;  %v1127_v19 = vpop.f32.mrb[29].mxu1  ;;  %v1160_v51 = vmul.f32 1.442695, %v1147_v45  ;;  %v1126_v18 = vadd.f32 %v1125_v43, %v2232_v7  ;;  %v1250_v57 = vadd.f32 1.0, %v1249_v44 }
 0x3b1   :  { %1698 = vpow2.f32 %v1158_v42  ;;  %v1129_v26 = vpop.f32.mrb[30].mxu1  ;;  %v1261_v58 = vand.u32 2147483647, %v2283_v35  ;;  %v1227_v62 = vsub.f32 0.0, %v1219_v55  ;;  %v1259_v5 = vadd.f32 1.0, %v1258_v50 }
 0x3b2   :  { %v1683_v49 = vpop.eup %1682  ;;  %1700 = vpow2.f32 %v1238_v16  ;;  %v2309_v53 = vpop.f32.mrb[31].mxu1  ;;  %v1140_v0 = vadd.f32 %v1126_v18, %v941_v15  ;;  %v2322_v9 = vadd.f32 %v1127_v19, %v2235_v8  ;;  %vm2324_vm0 = vcmp.lt.f32.partialorder %v1252_v28, 0.0004427343 }
 0x3b3   :  { %v2311_v54 = vpop.eup %1684  ;;  %v1168_v2 = vadd.f32 1.0, %v1683_v49  ;;  %1702 = vpow2.f32 %v1160_v51  ;;  %v1208_v14 = vmax.f32 %v2255_v46, 0.0  ;;  %v1240_v63 = vmul.f32 1.442695, %v1227_v62 }
 0x3b4   :  { %v1687_v56 = vpop.eup %1686  ;;  %v1264_v59 = vadd.f32 1.0, %v2311_v54  ;;  %v1251_v22 = vmul.f32 %v2275_v17, %v1250_v57  ;;  %v1148_v1 = vsub.f32 0.0, %v1140_v0  ;;  %vm2330_vm1 = vcmp.lt.f32.partialorder %v1261_v58, 0.0004427343 }
 0x3b5   :  { %v2318_v60 = vpop.eup %1688  ;;  %1704 = vrcp.f32 %v1168_v2  ;;  %v1169_v61 = vadd.f32 1.0, %v1687_v56  ;;  %v1267_v34 = vmul.f32 -0.5, %v2311_v54  ;;  %v1260_v38 = vmul.f32 %v2283_v35, %v1259_v5 }
 0x3b6   :  { %1706 = vlog2.f32 %v1264_v59  ;;  %v1273_v32 = vadd.f32 1.0, %v2318_v60  ;;  %v1162_v41 = vmul.f32 1.442695, %v1148_v1  ;;  %v1276_v43 = vmul.f32 -0.5, %v2318_v60 }
 0x3b7   :  { %v1691_v40 = vpop.eup %1690  ;;  %1708 = vrcp.f32 %v1169_v61  ;;  %v1130_v44 = vadd.f32 %v1129_v26, %v2232_v7  ;;  %v1268_v49 = vadd.f32 1.0, %v1267_v34  ;;  %v1270_v50 = vand.u32 2147483647, %v2311_v54 }
 0x3b8   :  { %v1693_v4 = vpop.eup %1692  ;;  %v1190_v3 = vmul.f32 %v1691_v40, %v913_v12  ;;  %1710 = vlog2.f32 %v1273_v32  ;;  %v1220_v12 = vand.u32 2147483647, %v2322_v9  ;;  %v1277_v55 = vadd.f32 1.0, %v1276_v43 }
 0x3b9   :  { %v1695_v30 = vpop.eup %1694  ;;  %v1248_v31 = vmul.f32 0.6931472, %v1693_v4  ;;  %1712 = vpow2.f32 %v1240_v63  ;;  %v1141_v61 = vadd.f32 %v1130_v44, %v2301_v47  ;;  %v2353_v5 = vadd.f32 %v2309_v53, %v2235_v8 }
 0x3ba   :  { %v1697_v36 = vpop.eup %1696  ;;  %1198 = vst [vmem:[#allocation2] sm:$0xff] %v1190_v3  ;;  %v1191_v37 = vmul.f32 %v1695_v30, %v917_v24  ;;  %1714 = vpow2.f32 %v1162_v41  ;;  %v1228_v24 = vsub.f32 0.0, %v1220_v12  ;;  %vm1271_vm2 = vcmp.lt.f32.partialorder %v1270_v50, 0.0004427343 }
 0x3bb   :  { %v1699_v17 = vpop.eup %1698  ;;  %v1254_v15 = vsel %vm2324_vm0, %v1251_v22, %v1248_v31  ;;  %v1257_v42 = vmul.f32 0.6931472, %v1697_v36  ;;  %v1149_v11 = vsub.f32 0.0, %v1141_v61  ;;  %v1278_v3 = vmul.f32 %v2318_v60, %v1277_v55 }
 0x3bc   :  { %v2341_v16 = vpop.eup %1700  ;;  %v1318_v45 = vadd.f32 %v1254_v15, %v1206_v48  ;;  %1199 = vst [vmem:[#allocation2 + $0x8] sm:$0xff] %v1191_v37  ;;  %v1170_v19 = vadd.f32 1.0, %v1699_v17  ;;  %v1242_v7 = vmul.f32 1.442695, %v1228_v24  ;;  %v1279_v48 = vand.u32 2147483647, %v2318_v60 }
 0x3bd   :  { %v1263_v35 = vsel %vm2330_vm1, %v1260_v38, %v1257_v42  ;;  %v1282_v51 = vadd.f32 1.0, %v2341_v16  ;;  %v1703_v18 = vpop.eup %1702  ;;  %v1209_v53 = vmax.f32 %v2262_v52, 0.0  ;;  %v1164_v30 = vmul.f32 1.442695, %v1149_v11 }
 0x3be   :  { %v1326_v28 = vadd.f32 1e-06, %v1318_v45  ;;  %v1319_v2 = vadd.f32 %v1263_v35, %v1207_v6  ;;  %1716 = vrcp.f32 %v1170_v19  ;;  %v1171_v56 = vadd.f32 1.0, %v1703_v18 }
 0x3bf   :  { %v1705_v26 = vpop.eup %1704  ;;  %1718 = vlog2.f32 %v1282_v51  ;;  %v1269_v6 = vmul.f32 %v2311_v54, %v1268_v49  ;;  %v1221_v54 = vand.u32 2147483647, %v2353_v5  ;;  %vm1280_vm3 = vcmp.lt.f32.partialorder %v1279_v48, 0.0004427343 }
 0x3c0   :  { %v1707_v57 = vpop.eup %1706  ;;  %1334 = vst [vmem:[#allocation4] sm:$0xff] %v1326_v28  ;;  %v1327_v58 = vadd.f32 1e-06, %v1319_v2  ;;  %v1192_v59 = vmul.f32 %v1705_v26, %v2289_v39  ;;  %1720 = vpow2.f32 %v1242_v7  ;;  %v1285_v39 = vmul.f32 -0.5, %v2341_v16 }
 0x3c1   :  { %v1709_v62 = vpop.eup %1708  ;;  %v1266_v0 = vmul.f32 0.6931472, %v1707_v57  ;;  %1722 = vrcp.f32 %v1171_v56  ;;  %v1229_v31 = vsub.f32 0.0, %v1221_v54  ;;  %v1288_v37 = vand.u32 2147483647, %v2341_v16 }
 0x3c2   :  { %v1711_v32 = vpop.eup %1710  ;;  %1335 = vst [vmem:[#allocation4 + $0x8] sm:$0xff] %v1327_v58  ;;  %1200 = vst [vmem:[#allocation2 + $0x10] sm:$0xff] %v1192_v59  ;;  %v1193_v40 = vmul.f32 %v1709_v62, %v2294_v13  ;;  %v933_v13 = vadd.f32 %v2190_v23, %v2266_v20  ;;  %v1286_v60 = vadd.f32 1.0, %v1285_v39  ;;  %v937_v15 = vadd.f32 %v2194_v25, %v2266_v20 }
 0x3c3   :  { %v1713_v63 = vpop.eup %1712  ;;  %v1272_v47 = vsel %vm1271_vm2, %v1269_v6, %v1266_v0  ;;  %v1275_v4 = vmul.f32 0.6931472, %v1711_v32  ;;  %v1210_v45 = vmax.f32 %v2272_v10, 0.0  ;;  %vm1289_vm4 = vcmp.lt.f32.partialorder %v1288_v37, 0.0004427343 }
 0x3c4   :  { %v1320_v8 = vadd.f32 %v1272_v47, %v1208_v14  ;;  %1201 = vst [vmem:[#allocation2 + $0x18] sm:$0xff] %v1193_v40  ;;  %v1291_v22 = vadd.f32 1.0, %v1713_v63  ;;  %v1715_v33 = vpop.eup %1714  ;;  %v1244_v14 = vmul.f32 1.442695, %v1229_v31  ;;  %v1294_v17 = vmul.f32 -0.5, %v1713_v63 }
 0x3c5   :  { %v1281_v1 = vsel %vm1280_vm3, %v1278_v3, %v1275_v4  ;;  %v1172_v46 = vadd.f32 1.0, %v1715_v33  ;;  %v1287_v43 = vmul.f32 %v2341_v16, %v1286_v60  ;;  %v1297_v51 = vand.u32 2147483647, %v1713_v63 }
 0x3c6   :  { %v1328_v34 = vadd.f32 1e-06, %v1320_v8  ;;  %v1321_v36 = vadd.f32 %v1281_v1, %v1209_v53  ;;  %1724 = vlog2.f32 %v1291_v22  ;;  %v1295_v50 = vadd.f32 1.0, %v1294_v17 }
 0x3c7   :  { %1726 = vpow2.f32 %v1164_v30  ;;  %v943_v26 = vadd.f32 %v2198_v27, %v2266_v20  ;;  %v1211_v10 = vmax.f32 %v2305_v21, 0.0  ;;  %vm1298_vm5 = vcmp.lt.f32.partialorder %v1297_v51, 0.0004427343 }
 0x3c8   :  { %v1717_v38 = vpop.eup %1716  ;;  %1336 = vst [vmem:[#allocation4 + $0x10] sm:$0xff] %v1328_v34  ;;  %v1329_v52 = vadd.f32 1e-06, %v1321_v36  ;;  %1728 = vrcp.f32 %v1172_v46  ;;  %v1296_v7 = vmul.f32 %v1713_v63, %v1295_v50  ;;  %v1212_v21 = vmax.f32 %v2322_v9, 0.0 }
 0x3c9   :  { %v1719_v41 = vpop.eup %1718  ;;  %v1194_v12 = vmul.f32 %v1717_v38, %v933_v13  ;;  %1730 = vpow2.f32 %v1244_v14  ;;  %v947_v47 = vadd.f32 %v2202_v29, %v2266_v20 }
 0x3ca   :  { %v1721_v23 = vpop.eup %1720  ;;  %1337 = vst [vmem:[#allocation4 + $0x18] sm:$0xff] %v1329_v52  ;;  %v1284_v42 = vmul.f32 0.6931472, %v1719_v41 }
 0x3cb   :  { %v1723_v44 = vpop.eup %1722  ;;  %1202 = vst [vmem:[#allocation2 + $0x20] sm:$0xff] %v1194_v12  ;;  %v1300_v19 = vadd.f32 1.0, %v1721_v23  ;;  %v1303_v28 = vmul.f32 -0.5, %v1721_v23  ;;  %v1306_v62 = vand.u32 2147483647, %v1721_v23 }
 0x3cc   :  { %v1290_v24 = vsel %vm1289_vm4, %v1287_v43, %v1284_v42  ;;  %v1195_v35 = vmul.f32 %v1723_v44, %v937_v15 }
 0x3cd   :  { %v1322_v49 = vadd.f32 %v1290_v24, %v1210_v45  ;;  %1732 = vlog2.f32 %v1300_v19  ;;  %v1304_v61 = vadd.f32 1.0, %v1303_v28  ;;  %vm1307_vm6 = vcmp.lt.f32.partialorder %v1306_v62, 0.0004427343 }
 0x3ce   :  { %1203 = vst [vmem:[#allocation2 + $0x28] sm:$0xff] %v1195_v35 }
 0x3cf   :  { %v1330_v18 = vadd.f32 1e-06, %v1322_v49  ;;  %v1305_v27 = vmul.f32 %v1721_v23, %v1304_v61 }
 0x3d0   :  { %v1725_v25 = vpop.eup %1724 }
 0x3d1   :  { %v1727_v2 = vpop.eup %1726  ;;  %1338 = vst [vmem:[#allocation4 + $0x20] sm:$0xff] %v1330_v18  ;;  %v1293_v16 = vmul.f32 0.6931472, %v1725_v25 }
 0x3d2   :  { %v1173_v55 = vadd.f32 1.0, %v1727_v2  ;;  %v1729_v48 = vpop.eup %1728 }
 0x3d3   :  { %v1299_v56 = vsel %vm1298_vm5, %v1296_v7, %v1293_v16  ;;  %v1731_v57 = vpop.eup %1730  ;;  %v1196_v59 = vmul.f32 %v1729_v48, %v943_v26 }
 0x3d4   :  { %v1323_v58 = vadd.f32 %v1299_v56, %v1211_v10  ;;  %1734 = vrcp.f32 %v1173_v55  ;;  %v1309_v0 = vadd.f32 1.0, %v1731_v57  ;;  %v1312_v11 = vmul.f32 -0.5, %v1731_v57 }
 0x3d5   :  { %1204 = vst [vmem:[#allocation2 + $0x30] sm:$0xff] %v1196_v59  ;;  %v1315_v53 = vand.u32 2147483647, %v1731_v57 }
 0x3d6   :  { %v1331_v6 = vadd.f32 1e-06, %v1323_v58  ;;  %1736 = vlog2.f32 %v1309_v0  ;;  %v1313_v54 = vadd.f32 1.0, %v1312_v11 }
 0x3d7   :  { %v1733_v32 = vpop.eup %1732 }
 0x3d8   :  { %1339 = vst [vmem:[#allocation4 + $0x28] sm:$0xff] %v1331_v6  ;;  %v1302_v40 = vmul.f32 0.6931472, %v1733_v32  ;;  %v1314_v9 = vmul.f32 %v1731_v57, %v1313_v54 }
 0x3da   :  { %v1308_v39 = vsel %vm1307_vm6, %v1305_v27, %v1302_v40 }
 0x3db   :  { %v1324_v63 = vadd.f32 %v1308_v39, %v1212_v21 }
 0x3dd   :  { %v1332_v4 = vadd.f32 1e-06, %v1324_v63 }
 0x3de   :  { %v1735_v3 = vpop.eup %1734 }
 0x3df   :  { %1340 = vst [vmem:[#allocation4 + $0x30] sm:$0xff] %v1332_v4  ;;  %v1197_v8 = vmul.f32 %v1735_v3, %v947_v47 }
 0x3e0   :  { %v1737_v22 = vpop.eup %1736 }
 0x3e1   :  { %1205 = vst [vmem:[#allocation2 + $0x38] sm:$0xff] %v1197_v8  ;;  %v1311_v13 = vmul.f32 0.6931472, %v1737_v22 }
 0x3e2   :  { %1749 = shalt.err (!%p1746_p4)
}
 0x3e3   :  { %s1750_s0 = scalar_lea.hbm %s2415_s15, 1024 }
 0x3e4   :  { %p1751_p5 = scmp.ne.s32.totalorder %s2415_s15, %s1750_s0  ;;  %p1754_p6 = scmp.lt.u32.totalorder %s1750_s0, %s2415_s15 }
 0x3e6   :  { %p1756_p7 = pnand %p1754_p6, %p1751_p5 }
 0x3e8   :  { %1759 = shalt.err (!%p1756_p7)
}
 0x3e9   :  { %s1788_s21 = smov 128   ;;  %s1789_s22 = smov 8   ;;  %v1213_v29 = vmax.f32 %v2353_v5, 0.0  ;;  %vm1316_vm7 = vcmp.lt.f32.partialorder %v1315_v53, 0.0004427343 }
 0x3ea   :  { %1353 = dma.vmem_to_hbm [thread:$0]  %s1348_s14, 1024, %s2415_s15, [#allocation3], %s1788_s21, %s1788_s21, %s1789_s22   ;;  %v1317_v20 = vsel %vm1316_vm7, %v1314_v9, %v1311_v13 }
 0x3eb   :  { %s1790_s11 = smov [#allocation4]   ;;  %v1325_v1 = vadd.f32 %v1317_v20, %v1213_v29 }
 0x3ec   :  { %s1359_s24 = sshll.u32 %s1790_s11, 4  ;;  %s1360_s24 = int_to_ptr.vmem [resolvable:$true] %s1359_s24 }
 0x3ed   :  { %v1333_v30 = vadd.f32 1e-06, %v1325_v1  ;;  %s1760_s3 = scalar_lea.vmem %s1360_s24, 1024  ;;  %p1765_p9 = scmp.lt.s32.totalorder %s1360_s24, %s1360_s24 }
 0x3ee   :  { %p1761_p8 = scmp.ne.s32.totalorder %s1360_s24, %s1760_s3  ;;  %p1766_p10 = scmp.lt.s32.totalorder %s1760_s3, %s1760_s3 }
 0x3ef   :  { %1341 = vst [vmem:[#allocation4 + $0x38] sm:$0xff] %v1333_v30 }
 0x3f0   :  { %p1767_p11 = por %p1766_p10, %p1765_p9 }
 0x3f2   :  { %p1768_p12 = pnand %p1767_p11, %p1761_p8 }
 0x3f4   :  { %1771 = shalt.err (!%p1768_p12)
}
 0x3f5   :  { %s1772_s15 = scalar_lea.hbm %s2416_s16, 1024 }
 0x3f6   :  { %p1773_p13 = scmp.ne.s32.totalorder %s2416_s16, %s1772_s15  ;;  %p1776_p0 = scmp.lt.u32.totalorder %s1772_s15, %s2416_s16 }
 0x3f8   :  { %p1778_p1 = pnand %p1776_p0, %p1773_p13 }
 0x3fa   :  { %1781 = shalt.err (!%p1778_p1)
}
 0x3fb   :  { %1365 = dma.vmem_to_hbm [thread:$0]  %s1360_s24, 1024, %s2416_s16, [#allocation5], %s1788_s21, %s1788_s21, %s1789_s22  }
 0x3fc   :  { %1782 = dma.done.wait [#allocation3], 1024  }
 0x3fd   :  { %1783 = vsyncadd [#allocation3], 4294966272 }
 0x3fe   :  { %1784 = dma.done.wait [#allocation5], 1024  }
 0x3ff   :  { %1785 = vsyncadd [#allocation5], 4294966272 }
 0x400   :  { %1372 = vsyncpa [#allocation3], 1 }
 0x401   :  { %1373 = vsyncpa [#allocation5], 1 }

</bundles_post_ra>
